<compile_context>
chip_gen: v7x
topology: tpu7x:2x2x1
jax: 0.10.0
libtpu: 0.0.40
codegen_flags: <defaults>
</compile_context>

<pallas_src>
import math
import functools

import jax
import jax.numpy as jnp
from jax.experimental import pallas as pl
from jax.experimental.pallas import tpu as pltpu


# ----------------------------------------------------------------------------
# Pallas kernel
# ----------------------------------------------------------------------------

def _posenc_rows_kernel(x_ref, o_ref, *, n_batch, d_model, block_rows):
    """One (block_rows, d_model) tile of the flattened (S*N, d_model) view.

    Flat row r corresponds to (seq = r // n_batch, batch = r % n_batch); the
    positional encoding depends only on seq, so it is regenerated here from
    iotas instead of being streamed from HBM.
    """
    shape = (block_rows, d_model)
    row = jax.lax.broadcasted_iota(jnp.int32, shape, 0) + pl.program_id(0) * block_rows
    col = jax.lax.broadcasted_iota(jnp.int32, shape, 1)

    rowf = row.astype(jnp.float32)
    colf = col.astype(jnp.float32)

    # pos = row // n_batch, done in f32 (exact: seq positions here are far
    # below 2**22 / n_batch, so rounding never crosses an integer boundary).
    pos = jnp.floor((rowf + 0.5) / n_batch)
    # half = col // 2 (exact in f32); div_term[k] = exp(-(2k) * ln(10000) / d_model)
    half = jnp.floor(colf * 0.5)
    inv_freq = jnp.exp(half * (-2.0 * math.log(10000.0) / d_model))
    angle = pos * inv_freq
    pe = jnp.where((col & 1) == 0, jnp.sin(angle), jnp.cos(angle))

    # Add in f32 (dtype-independent result), cast back to activation dtype on
    # the store — explicit handling of bf16 inputs per review.
    o_ref[...] = (x_ref[...].astype(jnp.float32) + pe).astype(o_ref.dtype)
    # TODO(synk): training-mode dropout (torch RNG, p=0.1) not reproduced;
    # eval-mode dropout is identity, which is what is implemented here.


# ----------------------------------------------------------------------------
# Wrapper helpers
# ----------------------------------------------------------------------------

def make_positional_encoding(d_model, max_len=5000, dtype=jnp.float32):
    """Same pe buffer as the PyTorch module: shape (max_len, 1, d_model)."""
    position = jnp.arange(max_len, dtype=jnp.float32)[:, None]
    div_term = jnp.exp(
        jnp.arange(0, d_model, 2, dtype=jnp.float32) * (-math.log(10000.0) / d_model)
    )
    pe = jnp.zeros((max_len, d_model), jnp.float32)
    pe = pe.at[:, 0::2].set(jnp.sin(position * div_term))
    pe = pe.at[:, 1::2].set(jnp.cos(position * div_term))
    return pe[:, None, :].astype(dtype)


def _vmem_capacity_bytes():
    try:
        cap = getattr(pltpu.get_tpu_info(), "vmem_capacity_bytes", None)
        if cap:
            return int(cap)
    except Exception:
        pass
    return 64 * 1024 * 1024  # conservative fallback (v7x per-TensorCore VMEM)


def _round_up(v, m):
    return -(-v // m) * m


def _choose_block_rows(rows_total, row_bytes, vmem_budget_bytes):
    """Largest 8-row-multiple tile whose 4x pipelined footprint fits the budget."""
    if rows_total <= 8:
        return rows_total  # single full block (block dims == array dims)
    # Pipelined VMEM footprint ~= (in + out) * double-buffer = 4 * TR * row_bytes.
    budget_rows = max(8, (vmem_budget_bytes // (4 * row_bytes)) // 8 * 8)
    if rows_total > 2 * budget_rows:
        return budget_rows
    # Fits easily: still aim for >= 4 grid steps so v7x's 2 TensorCores both
    # get work and DMA/compute overlap hides per-step overhead.
    return min(budget_rows, _round_up(pl.cdiv(rows_total, 4), 8))


# ----------------------------------------------------------------------------
# Forward
# ----------------------------------------------------------------------------

def positional_encoding_forward(x, pe, *, force_pallas=False,
                                min_pallas_bytes=64 * 1024, donate_x=False):
    """x: (S, N, E) seq-first activations; pe: (max_len, 1, E) buffer.

    The Pallas path regenerates pe in-kernel (identical formula to the buffer),
    so `pe` is only read by the tiny-input fallback.
    """
    S, N, E = x.shape
    assert S <= pe.shape[0], "sequence length exceeds max_len of the pe buffer"

    itemsize = jnp.dtype(x.dtype).itemsize
    total_bytes = S * N * E * itemsize
    if total_bytes < min_pallas_bytes and not force_pallas:
        # Launch/DMA-setup overhead dwarfs the work at this size; let XLA fuse.
        return (x + pe[:S].astype(jnp.float32)).astype(x.dtype)

    rows_total = S * N
    row_bytes = E * itemsize
    vmem_cap = _vmem_capacity_bytes()
    block_rows = _choose_block_rows(rows_total, row_bytes, int(vmem_cap * 0.45))
    grid = (pl.cdiv(rows_total, block_rows),)

    xr = x.reshape(rows_total, E)  # free view of the contiguous (S, N, E) layout

    kernel = functools.partial(
        _posenc_rows_kernel, n_batch=N, d_model=E, block_rows=block_rows)

    out = pl.pallas_call(
        kernel,
        out_shape=jax.ShapeDtypeStruct((rows_total, E), x.dtype),
        grid=grid,
        in_specs=[pl.BlockSpec((block_rows, E), lambda i: (i, 0))],
        out_specs=pl.BlockSpec((block_rows, E), lambda i: (i, 0)),
        # Output reuses x's HBM buffer only if the caller donates x into the
        # jit; otherwise XLA would insert a defensive copy, so keep it opt-in.
        input_output_aliases=({0: 0} if donate_x else {}),
        compiler_params=pltpu.CompilerParams(
            dimension_semantics=("parallel",),
            vmem_limit_bytes=int(vmem_cap * 0.75)),
    )(xr)
    return out.reshape(S, N, E)


# ----------------------------------------------------------------------------
# Main
# ----------------------------------------------------------------------------

if __name__ == "__main__":
    MAX_LEN = 5000
    key = jax.random.PRNGKey(0)

    # --- Toy shape consistent with the module (seq-first layout). -----------
    S0, N0, E0 = 8, 2, 32
    x0 = jax.random.normal(jax.random.fold_in(key, 0), (S0, N0, E0), jnp.float32)
    pe0 = make_positional_encoding(E0, max_len=MAX_LEN)

    fwd_force = jax.jit(functools.partial(positional_encoding_forward,
                                          force_pallas=True))
    out0 = fwd_force(x0, pe0)
    jax.block_until_ready(out0)
    ref0 = x0 + pe0[:S0]
    assert out0.shape == (S0, N0, E0)
    assert bool(jnp.all(jnp.isfinite(out0)))
    assert bool(jnp.allclose(out0, ref0, atol=1e-4, rtol=1e-4))

    # --- Larger, lane/sublane-dense case: multi-block grid, f32 and bf16. ---
    S1, N1, E1 = 64, 8, 128
    pe1 = make_positional_encoding(E1, max_len=MAX_LEN)
    fwd = jax.jit(positional_encoding_forward)
    for dt, tol in ((jnp.float32, 1e-4), (jnp.bfloat16, 5e-2)):
        x1 = jax.random.normal(jax.random.fold_in(key, 1), (S1, N1, E1),
                               jnp.float32).astype(dt)
        out1 = fwd(x1, pe1)
        jax.block_until_ready(out1)
        ref1 = (x1.astype(jnp.float32) + pe1[:S1]).astype(dt).astype(jnp.float32)
        got1 = out1.astype(jnp.float32)
        assert out1.shape == (S1, N1, E1)
        assert bool(jnp.all(jnp.isfinite(got1)))
        assert bool(jnp.allclose(got1, ref1, atol=tol, rtol=tol))

    print("KERNEL_OK")
</pallas_src>

<mosaic_0001>
module attributes {stable_mosaic.version = 11 : i64} {
  func.func @_posenc_rows_kernel(%arg0: i32, %arg1: memref<8x32xf32, #tpu.memory_space<vmem>>, %arg2: memref<8x32xf32, #tpu.memory_space<vmem>>) attributes {dimension_semantics = [#tpu.dimension_semantics<parallel>], iteration_bounds = array<i64: 2>, scalar_prefetch = 0 : i64, scratch_operands = 0 : i64, tpu.core_type = #tpu.core_type<tc>, window_params = [{transform_indices = @transform_0, window_bounds = array<i64: 8, 32>}, {transform_indices = @transform_1, window_bounds = array<i64: 8, 32>}]} {
    %0 = tpu.iota {dimensions = array<i32: 0>} : vector<8x32xi32>
    %c8_i32 = arith.constant 8 : i32
    %1 = arith.muli %arg0, %c8_i32 : i32
    %2 = vector.broadcast %1 : i32 to vector<8x32xi32>
    %3 = arith.addi %0, %2 : vector<8x32xi32>
    %4 = tpu.iota {dimensions = array<i32: 1>} : vector<8x32xi32>
    %5 = arith.sitofp %3 : vector<8x32xi32> to vector<8x32xf32>
    %6 = arith.sitofp %4 : vector<8x32xi32> to vector<8x32xf32>
    %cst = arith.constant 5.000000e-01 : f32
    %7 = vector.broadcast %cst : f32 to vector<8x32xf32>
    %8 = arith.addf %5, %7 : vector<8x32xf32>
    %cst_0 = arith.constant 2.000000e+00 : f32
    %9 = vector.broadcast %cst_0 : f32 to vector<8x32xf32>
    %10 = arith.divf %8, %9 : vector<8x32xf32>
    %11 = math.floor %10 : vector<8x32xf32>
    %cst_1 = arith.constant 5.000000e-01 : f32
    %12 = vector.broadcast %cst_1 : f32 to vector<8x32xf32>
    %13 = arith.mulf %6, %12 : vector<8x32xf32>
    %14 = math.floor %13 : vector<8x32xf32>
    %cst_2 = arith.constant -0.575646281 : f32
    %15 = vector.broadcast %cst_2 : f32 to vector<8x32xf32>
    %16 = arith.mulf %14, %15 : vector<8x32xf32>
    %17 = math.exp %16 : vector<8x32xf32>
    %18 = arith.mulf %11, %17 : vector<8x32xf32>
    %c1_i32 = arith.constant 1 : i32
    %19 = vector.broadcast %c1_i32 : i32 to vector<8x32xi32>
    %20 = arith.andi %4, %19 : vector<8x32xi32>
    %c0_i32 = arith.constant 0 : i32
    %21 = vector.broadcast %c0_i32 : i32 to vector<8x32xi32>
    %22 = arith.cmpi eq, %20, %21 : vector<8x32xi32>
    %23 = math.sin %18 : vector<8x32xf32>
    %24 = math.cos %18 : vector<8x32xf32>
    %25 = arith.select %22, %23, %24 : vector<8x32xi1>, vector<8x32xf32>
    %c0 = arith.constant 0 : index
    %c0_3 = arith.constant 0 : index
    %26 = vector.load %arg1[%c0, %c0_3] : memref<8x32xf32, #tpu.memory_space<vmem>>, vector<8x32xf32>
    %27 = arith.addf %26, %25 : vector<8x32xf32>
    %c0_4 = arith.constant 0 : index
    %c0_5 = arith.constant 0 : index
    %28 = vector.load %arg2[%c0_4, %c0_5] : memref<8x32xf32, #tpu.memory_space<vmem>>, vector<8x32xf32>
    tpu.vector_store %arg2[%c0_4, %c0_5], %27 {strides = array<i32>} : memref<8x32xf32, #tpu.memory_space<vmem>>, vector<8x32xf32>,
    return
  }
  func.func @transform_0(%arg0: i32) -> (i32, i32) {
    %c0_i32 = arith.constant 0 : i32
    %c0_i32_0 = arith.constant 0 : i32
    return %arg0, %c0_i32 : i32, i32
  }
  func.func @transform_1(%arg0: i32) -> (i32, i32) {
    %c0_i32 = arith.constant 0 : i32
    %c0_i32_0 = arith.constant 0 : i32
    return %arg0, %c0_i32 : i32, i32
  }
}

</mosaic_0001>

<bundles_post_ra>
// kernel: positional_encoding_forward.1
= control target key start
LH: loop header
LB: loop body
LE: loop exit
PB: predicated region body
PF: predicated region fallthrough
CT: control target
= control target key end

     0   :  { %6 = vsyncpa [#allocation3], 0  ;;  %s842_s0 = inlined_call_operand.hbm [shape: f32[16,32], index: 0, kind: input, shape index: {}]   ;;  %s843_s1 = inlined_call_operand.hbm [shape: f32[16,32], index: 1, kind: output, shape index: {}]  }
   0x1   :  { %8 = vsyncpa [#allocation3 + $0x1], 0 }
   0x2   :  { %9 = vsyncpa [#allocation4], 0 }
   0x3   :  { %11 = vsyncpa [#allocation4 + $0x1], 0  ;;  %s648_s6 = smov 0   ;;  %s650_s7 = smov 0  }
   0x4   :  { %s652_s8 = smov 0   ;;  %s654_s9 = smov 0  }
   0x5 LB: > { %s669_s10 = sadd.s32 4294967295, %s628_s9   ;;  %s449_s11 = sadd.s32 4294967294, %s628_s9   ;;  %s628_s9 = sphi %s654_s9, %s858_s9   ;;  %s624_s8 = sphi %s652_s8, %s857_s8   ;;  %s620_s7 = sphi %s650_s7, %s856_s7   ;;  %s616_s6 = sphi %s648_s6, %s855_s6  }
   0x6   : > { %s673_s12 = sadd.s32 1, %s628_s9   ;;  %s24_s13 = sadd.s32 1, %s624_s8 }
   0x7   : > { %s21_s14 = ssub.s32 %s628_s9, %s673_s12  ;;  %p31_p0 = scmp.ne.s32.totalorder %s624_s8, %s620_s7 }
   0x8   : > { %p22_p1 = scmp.eq.s32.totalorder %s21_s14, 0  ;;  %p32_p2 = scmp.eq.s32.totalorder %s628_s9, 0 }
   0x9   : > { %p37_p3 = scmp.ne.s32.totalorder %s620_s7, %s616_s6  ;;  %p38_p4 = scmp.eq.s32.totalorder %s669_s10, 0 }
   0xa   : > { %s685_s15 = scalar_select %p22_p1, %s624_s8, %s24_s13  }
   0xb   : > { %p687_p5 = por %p32_p2, %p31_p0  ;;  %p691_p6 = por %p38_p4, %p37_p3 }
   0xc   : > { %p61_p7 = scmp.eq.s32.totalorder %s669_s10, 1  ;;  %p67_p8 = scmp.eq.s32.totalorder %s449_s11, 1 }
   0xd   : > { %p486_p10 = scmp.lt.s32.totalorder %s628_s9, 2  ;;  %s87_s20 = sand.u32 1, %s624_s8  }
   0xe   : > { %p698_p11 = por %p61_p7, %p31_p0  ;;  %p702_p12 = por %p67_p8, %p37_p3 }
   0xf   : > { %s453_s21 = sshll.u32 %s628_s9, 7  ;;  %s452_s22 = sshll.u32 %s87_s20, 3 }
  0x10   : > { %s847_s18 = scalar_select %p698_p11, 1, 0 }
  0x11   : > { %s848_s19 = scalar_select %p702_p12, 1, 0 }
  0x12   : > { %s711_s25 = scalar_lea.hbm %s842_s0, %s453_s21  ;;  %s91_s26 = scalar_lea.vmem [#allocation2], %s452_s22 }
  0x13   : > { %s98_s27 = sshll.u32 %s91_s26, 4  ;;  %p715_p13 = pnand %p486_p10, %p687_p5  ;;  %s719_s27 = int_to_ptr.vmem [resolvable:$true] %s98_s27 }
  0x14   : > { %s88_s29 = scalar_lea.sflag [#allocation3], %s87_s20  ;;  %s532_s30 = scalar_lea.hbm %s711_s25, 128 }
  0x15   : > { %p533_p2 = scmp.ne.s32.totalorder %s711_s25, %s532_s30  ;;  %p534_p3 = pneg %p715_p13 }
  0x16   : > { %s537_s4 = scalar_lea.hbm %s842_s0, 256  ;;  %p538_p5 = scmp.lt.u32.totalorder %s711_s25, %s842_s0 }
  0x17   : > { %p535_p4 = pnand %p534_p3, %p533_p2  ;;  %p539_p8 = scmp.lt.u32.totalorder %s537_s4, %s532_s30 }
  0x18   : > { %p541_p9 = scmp.lt.u32.totalorder %s532_s30, %s711_s25 }
  0x19   : > { %p536_p7 = pneg %p535_p4  ;;  %p540_p10 = por %p539_p8, %p538_p5 }
  0x1b   : > { %p542_p0 = por %p541_p9, %p540_p10 }
  0x1d   : > { %p543_p1 = pnand %p542_p0, %p536_p7 }
  0x1f   : > { %546 = shalt.err (!%p543_p1)
}
  0x20   : > { %s547_s13 = scalar_lea.vmem %s719_s27, 128  ;;  %s630_s14 = smov [#allocation2]  }
  0x21   : > { %p548_p2 = scmp.ne.s32.totalorder %s719_s27, %s547_s13  ;;  %s552_s16 = sshll.u32 %s630_s14, 4  ;;  %s553_s16 = int_to_ptr.vmem [resolvable:$false] %s552_s16 }
  0x22   : > { %s554_s20 = scalar_lea.vmem %s553_s16, 256  ;;  %p555_p11 = scmp.lt.s32.totalorder %s719_s27, %s553_s16 }
  0x23   : > { %p550_p4 = pnand %p548_p2, %p534_p3  ;;  %p556_p5 = scmp.lt.s32.totalorder %s554_s20, %s547_s13 }
  0x25   : > { %p551_p12 = pneg %p550_p4  ;;  %p557_p8 = por %p556_p5, %p555_p11 }
  0x27   : > { %p558_p9 = pnand %p557_p8, %p551_p12 }
  0x29   : > { %561 = shalt.err (!%p558_p9)
}
  0x2a   : > { %481 = dma.hbm_to_vmem [thread:$0]  (!%p715_p13), %s711_s25, 128, %s719_s27, %s88_s29  }
  0x2b   : > { %p850_p0 = scmp.lt.s32.totalorder %s628_s9, 3  ;;  %p851_p1 = scmp.ge.s32.totalorder %s628_s9, 1 }
  0x2d   : > { %p104_p3 = pnand %p851_p1, %p850_p0 }
  0x2e   : > { %s753_s21 = sand.u32 (!%p104_p3), 1, %s620_s7  }
  0x2f   : > { %107 = sbr.rel (%p104_p3) target bundleno = 179 (0xb3), region = 24  ;;  %s455_s22 = sshll.u32 (!%p104_p3), %s753_s21, 3 }
  0x30   : > { %s110_s23 = scalar_lea.sflag (!%p104_p3), [#allocation3], %s753_s21  ;;  %s759_s24 = scalar_lea.vmem (!%p104_p3), [#allocation2], %s455_s22 }
  0x36   : > { %607 = dma.done.wait (%p691_p6), %s110_s23, 128  }
  0x37   : > { %609 = vsyncadd (%p691_p6), %s110_s23, 4294967168  ;;  %v132_v0 = vlaneseq  ;;  %s457_s25 = sshll.u32 %s669_s10, 3  ;;  %v631_v27 = vmov 683565275   ;;  %v632_v29 = vmov 2475754826  }
  0x38   : > { %v135_v2 = vstv %s457_s25  ;;  %v633_v31 = vmov 2131351028   ;;  %v634_v33 = vmov 2102212464   ;;  %v635_v35 = vmov 920167782  }
  0x39   : > { %v133_v1 = vshrl.u32 %v132_v0, 7  ;;  %v766_v3 = vand.u32 127, %v132_v0  ;;  %v636_v42 = vmov 1326507024   ;;  %s131_s17 = scalar_lea.vmem [#allocation5], %s455_s22  ;;  %s467_s27 = sshll.u32 %s669_s10, 7 }
  0x3a   : > { %s379_s26 = sshll.u32 %s131_s17, 4  ;;  %s800_s30 = scalar_lea.hbm %s843_s1, %s467_s27  ;;  %s795_s26 = int_to_ptr.vmem [resolvable:$true] %s379_s26 }
  0x3b   : > { %v140_v4 = vcvt.s32.f32 %v766_v3  ;;  %v136_v5 = vadd.s32 %v135_v2, %v133_v1  ;;  %s366_s2 = scalar_lea.sflag [#allocation4], %s753_s21  ;;  %s562_s3 = scalar_lea.vmem %s795_s26, 128 }
  0x3c   : > { %p563_p6 = scmp.ne.s32.totalorder %s795_s26, %s562_s3  ;;  %p852_p11 = scmp.ne.s32.totalorder %s847_s18, 0 }
  0x3d   : > { %v145_v6 = vmul.f32 0.5, %v140_v4  ;;  %v139_v8 = vcvt.s32.f32 %v136_v5  ;;  %s637_s10 = smov [#allocation5]  }
  0x3e   : > { %p564_p12 = pnand %p563_p6, %p852_p11  ;;  %s566_s4 = sshll.u32 %s637_s10, 4  ;;  %s567_s4 = int_to_ptr.vmem [resolvable:$false] %s566_s4 }
  0x3f   : > { %v146_v7 = vfloor.f32 %v145_v6  ;;  %v141_v11 = vadd.f32 0.5, %v139_v8  ;;  %s568_s5 = scalar_lea.vmem %s567_s4, 256  ;;  %p569_p7 = scmp.lt.s32.totalorder %s795_s26, %s567_s4 }
  0x40   : > { %p565_p13 = pneg %p564_p12  ;;  %p570_p10 = scmp.lt.s32.totalorder %s568_s5, %s562_s3 }
  0x41   : > { %v147_v9 = vmul.f32 -0.5756463, %v146_v7  ;;  %v143_v12 = vmul.f32 0.5, %v141_v11 }
  0x42   : > { %p571_p2 = por %p570_p10, %p569_p7 }
  0x43   : > { %v148_v10 = vmul.f32 1.442695, %v147_v9  ;;  %v144_v13 = vfloor.f32 %v143_v12 }
  0x44   : > { %p572_p4 = pnand %p571_p2, %p565_p13 }
  0x45   : > { %526 = vpow2.f32 %v148_v10 }
  0x4f   : > { %v527_v14 = vpop.eup %526 }
  0x50   : > { %v769_v15 = vmul.f32 %v527_v14, %v144_v13 }
  0x52   : > { %v156_v16 = vand.u32 2139095040, %v769_v15  ;;  %v153_v18 = vand.u32 2147483647, %v769_v15  ;;  %vm155_vm7 = vcmp.lt.s32.totalorder %v769_v15, 0  ;;  %vm245_vm15 = vweird.f32 %v769_v15 }
  0x54   : > { %v157_v17 = vshrl.u32 %v156_v16, 23  ;;  %v160_v21 = vand.u32 8388607, %v153_v18  ;;  %vm154_vm8 = vcmp.le.f32.partialorder %v153_v18, 0.7853982 }
  0x56   : > { %v458_v19 = vadd.s32 4294967169, %v157_v17  ;;  %v161_v24 = vor.u32 8388608, %v160_v21 }
  0x58   : > { %v163_v20 = vadd.s32 1, %v458_v19  ;;  %v201_v44 = vshll.u32 %v161_v24, 8 }
  0x5a   : > { %vm164_vm0 = vcmp.gt.s32.totalorder %v163_v20, 0 }
  0x5b   : > { %v165_v22 = vsel %vm164_vm0, %v163_v20, 0 }
  0x5c   : > { %v167_v23 = vand.u32 31, %v165_v22  ;;  %v166_v25 = vshrl.u32 %v165_v22, 5 }
  0x5e   : > { %v168_v26 = vsub.s32 32, %v167_v23  ;;  %v170_v28 = vshll.u32 %v631_v27, %v167_v23  ;;  %v173_v30 = vshll.u32 %v632_v29, %v167_v23  ;;  %v176_v32 = vshll.u32 %v633_v31, %v167_v23 }
  0x5f   : > { %v179_v34 = vshll.u32 %v634_v33, %v167_v23  ;;  %v182_v36 = vshll.u32 %v635_v35, %v167_v23  ;;  %vm185_vm1 = vcmp.lt.s32.totalorder %v166_v25, 1  ;;  %vm188_vm2 = vcmp.lt.s32.totalorder %v166_v25, 4 }
  0x60   : > { %v169_v37 = vshrl.u32 %v631_v27, %v168_v26  ;;  %v171_v38 = vshrl.u32 %v632_v29, %v168_v26  ;;  %v174_v39 = vshrl.u32 %v633_v31, %v168_v26  ;;  %v177_v40 = vshrl.u32 %v634_v33, %v168_v26 }
  0x61   : > { %v180_v41 = vshrl.u32 %v635_v35, %v168_v26  ;;  %v183_v43 = vshrl.u32 %v636_v42, %v168_v26  ;;  %vm186_vm3 = vcmp.lt.s32.totalorder %v166_v25, 2  ;;  %vm187_vm4 = vcmp.lt.s32.totalorder %v166_v25, 3 }
  0x62   : > { %v172_v45 = vor.u32 %v171_v38, %v170_v28  ;;  %v175_v46 = vor.u32 %v174_v39, %v173_v30  ;;  %v178_v47 = vor.u32 %v177_v40, %v176_v32  ;;  %v151_v40 = vand.u32 1, %v766_v3 }
  0x63   : > { %v181_v48 = vor.u32 %v180_v41, %v179_v34  ;;  %v184_v49 = vor.u32 %v183_v43, %v182_v36 }
  0x64   : > { %v189_v50 = vsel %vm185_vm1, %v169_v37, %v172_v45  ;;  %v190_v51 = vsel %vm188_vm2, %v178_v47, 2102212464  ;;  %v193_v52 = vsel %vm185_vm1, %v172_v45, %v175_v46  ;;  %v197_v53 = vsel %vm185_vm1, %v175_v46, %v178_v47 }
  0x65   : > { %v191_v54 = vsel %vm187_vm4, %v175_v46, %v190_v51  ;;  %v194_v55 = vsel %vm188_vm2, %v181_v48, 920167782  ;;  %v198_v56 = vsel %vm188_vm2, %v184_v49, 1326507024  ;;  %vm152_vm0 = vcmp.eq.s32.totalorder %v151_v40, 0 }
  0x66   : > { %v195_v57 = vsel %vm187_vm4, %v178_v47, %v194_v55  ;;  %v199_v58 = vsel %vm187_vm4, %v181_v48, %v198_v56  ;;  %v192_v59 = vsel %vm186_vm3, %v189_v50, %v191_v54  ;;  %v361_v48 = vld [vmem:[%s759_s24] sm:$0xff]  ;;  %vm363_vm1 = vcmask 261120  }
  0x67   : > { %v196_v60 = vsel %vm186_vm3, %v193_v52, %v195_v57  ;;  %v200_v61 = vsel %vm186_vm3, %v197_v53, %v199_v58  ;;  %v208_v2 = vmul.u32 %v201_v44, %v192_v59 }
  0x68   : > { %v775_v62 = vmul.u32.u64.low %v201_v44, %v200_v61  ;;  %v776_v63 = vmul.u32.u64.high %v201_v44, %v200_v61, %v775_v62  ;;  %v778_v0 = vmul.u32.u64.low %v201_v44, %v196_v60  ;;  %v779_v1 = vmul.u32.u64.high %v201_v44, %v196_v60, %v778_v0 }
  0x6a   : > { %vm210_vm5 = vc.u32 %v776_v63, %v778_v0  ;;  %v211_v4 = vadd.s32 1, %v779_v1  ;;  %v209_v16 = vadd.s32 %v778_v0, %v776_v63 }
  0x6c   : > { %v212_v5 = vsel %vm210_vm5, %v211_v4, %v779_v1 }
  0x6d   : > { %v213_v6 = vadd.s32 %v212_v5, %v208_v2 }
  0x6f   : > { %v214_v7 = vadd.s32 536870912, %v213_v6 }
  0x71   : > { %v215_v8 = vshrl.u32 %v214_v7, 30 }
  0x73   : > { %v216_v9 = vshll.u32 %v215_v8, 30  ;;  %v239_v29 = vsub.s32 4, %v215_v8 }
  0x75   : > { %v217_v10 = vsub.s32 %v213_v6, %v216_v9  ;;  %v240_v32 = vsel %vm155_vm7, %v239_v29, %v215_v8 }
  0x76   : > { %v242_v35 = vsel %vm154_vm8, 0, %v240_v32 }
  0x77   : > { %v219_v11 = vsub.s32 0, %v217_v10  ;;  %v246_v36 = vadd.s32 3, %v242_v35  ;;  %v350_v38 = vand.u32 3, %v242_v35 }
  0x79   : > { %v459_v12 = vmin.u32 %v219_v11, %v217_v10  ;;  %v247_v37 = vand.u32 3, %v246_v36  ;;  %vm355_vm10 = vcmp.eq.s32.totalorder %v350_v38, 2  ;;  %vm352_vm12 = vcmp.eq.s32.totalorder %v350_v38, 0 }
  0x7a   : > { %vm351_vm14 = vcmp.lt.s32.totalorder %v350_v38, 2 }
  0x7b   : > { %v221_v13 = vclz %v459_v12  ;;  %vm252_vm9 = vcmp.eq.s32.totalorder %v247_v37, 2  ;;  %vm249_vm11 = vcmp.eq.s32.totalorder %v247_v37, 0  ;;  %vm248_vm13 = vcmp.lt.s32.totalorder %v247_v37, 2 }
  0x7d   : > { %v460_v14 = vadd.s32 4294967294, %v221_v13 }
  0x7f   : > { %vm461_vm6 = vcmp.lt.s32.totalorder %v460_v14, 0 }
  0x80   : > { %v224_v17 = vsel %vm461_vm6, 0, %v460_v14 }
  0x81   : > { %v225_v19 = vsub.s32 32, %v224_v17  ;;  %v226_v20 = vshll.u32 %v217_v10, %v224_v17  ;;  %v229_v21 = vsub.s32 4294967266, %v224_v17 }
  0x83   : > { %v227_v22 = vshrl.u32 %v209_v16, %v225_v19  ;;  %v230_v23 = vadd.s32 127, %v229_v21 }
  0x85   : > { %v228_v24 = vor.u32 %v227_v22, %v226_v20  ;;  %v231_v25 = vshll.u32 %v230_v23, 23 }
  0x87   : > { %v232_v26 = vor.u32 4788187, %v231_v25  ;;  %v235_v27 = vcvt.s32.f32 %v228_v24 }
  0x89   : > { %v233_v28 = vand.u32 2147483647, %v232_v26 }
  0x8b   : > { %v236_v30 = vmul.f32 %v235_v27, %v233_v28 }
  0x8d   : > { %v237_v31 = vxor.u32 2147483648, %v236_v30 }
  0x8f   : > { %v238_v33 = vsel %vm155_vm7, %v237_v31, %v236_v30 }
  0x90   : > { %v241_v34 = vsel %vm154_vm8, %v769_v15, %v238_v33 }
  0x91   : > { %528 = vcosq.f32 %v241_v34 }
  0x92   : > { %530 = vsinq.f32 %v241_v34 }
  0x9b   : > { %v529_v39 = vpop.eup %528 }
  0x9c   : > { %v531_v41 = vpop.eup %530  ;;  %v253_v18 = vxor.u32 2147483648, %v529_v39 }
  0x9d   : > { %v250_v42 = vxor.u32 2147483648, %v531_v41 }
  0x9e   : > { %v254_v43 = vsel %vm252_vm9, %v253_v18, %v531_v41  ;;  %v357_v44 = vsel %vm355_vm10, %v253_v18, %v531_v41 }
  0x9f   : > { %v251_v45 = vsel %vm249_vm11, %v529_v39, %v250_v42  ;;  %v354_v3 = vsel %vm352_vm12, %v529_v39, %v250_v42 }
  0xa0   : > { %v255_v46 = vsel %vm248_vm13, %v251_v45, %v254_v43  ;;  %v358_v47 = vsel %vm351_vm14, %v354_v3, %v357_v44 }
  0xa1   : > { %v256_v49 = vsel %vm245_vm15, nan, %v255_v46  ;;  %v359_v50 = vsel %vm245_vm15, nan, %v358_v47 }
  0xa2   : > { %v360_v51 = vsel %vm152_vm0, %v256_v49, %v359_v50 }
  0xa3   : > { %v362_v52 = vadd.f32 %v361_v48, %v360_v51 }
  0xa5   : > { %364 = vst.msk [vmem:[%s131_s17] sm:$0xff] %vm363_vm1, %v362_v52 }
  0xa6   : > { %575 = shalt.err (!%p572_p4)
}
  0xa7   : > { %s576_s11 = scalar_lea.hbm %s800_s30, 128  ;;  %s580_s16 = scalar_lea.hbm %s843_s1, 256 }
  0xa8   : > { %p577_p5 = scmp.ne.s32.totalorder %s800_s30, %s576_s11  ;;  %p581_p0 = scmp.lt.u32.totalorder %s800_s30, %s843_s1 }
  0xa9   : > { %p582_p1 = scmp.lt.u32.totalorder %s580_s16, %s576_s11  ;;  %p584_p6 = scmp.lt.u32.totalorder %s576_s11, %s800_s30 }
  0xaa   : > { %p578_p8 = pnand %p577_p5, %p852_p11 }
  0xab   : > { %p583_p3 = por %p582_p1, %p581_p0 }
  0xac   : > { %p579_p9 = pneg %p578_p8 }
  0xad   : > { %p585_p12 = por %p584_p6, %p583_p3 }
  0xaf   : > { %p586_p13 = pnand %p585_p12, %p579_p9 }
  0xb1   : > { %589 = shalt.err (!%p586_p13)
}
  0xb2   : > { %476 = dma.vmem_to_hbm [thread:$0]  (%p852_p11), %s795_s26, 128, %s800_s30, %s366_s2  }
  0xb3 PF: > { %s391_s22 = sand.u32 1, %s616_s6   ;;  %p853_p7 = scmp.ne.s32.totalorder %s848_s19, 0 }
  0xb4   : > { %p854_p10 = scmp.ge.s32.totalorder %s628_s9, 2  ;;  %s392_s23 = scalar_lea.sflag [#allocation4], %s391_s22 }
  0xb6   : > { %p483_p2 = pnand %p854_p10, %p853_p7 }
  0xb8   : > { %611 = dma.done.wait (!%p483_p2), %s392_s23, 128  }
  0xb9   : > { %613 = vsyncadd (!%p483_p2), %s392_s23, 4294967168  ;;  %p14_p4 = scmp.ge.s32.totalorder %s673_s12, 4   ;;  %s855_s6 = smov %s620_s7 }
  0xba   : > { %s856_s7 = smov %s624_s8  ;;  %s857_s8 = smov %s685_s15 }
  0xbb   : > { %s858_s9 = smov %s673_s12  ;;  %16 = sbr.rel (!%p14_p4) target bundleno = 5 (0x5), region = 69 }
  0xc2   :  { %397 = vsyncpa [#allocation3], 1 }
  0xc3   :  { %399 = vsyncpa [#allocation3 + $0x1], 1 }
  0xc4   :  { %400 = vsyncpa [#allocation4], 1 }
  0xc5   :  { %402 = vsyncpa [#allocation4 + $0x1], 1 }

</bundles_post_ra>
